<compile_context>
chip_gen: v7x
topology: tpu7x:2x2x1
jax: 0.10.0
libtpu: 0.0.40
codegen_flags: <defaults>
</compile_context>

<pallas_src>
import jax
import jax.numpy as jnp
import numpy as np
from jax import lax
from jax.experimental import pallas as pl
from jax.experimental.pallas import tpu as pltpu

NUM_CLASSES = 6
EPS = 1e-7
N_CORE_SPLIT = 2       # leading "parallel" grid axis (dual TensorCore on v7x)
TILE_N_MAX = 1024      # lanes per block; >=512 reaches ~85% of HBM roofline


def _cdiv(a, b):
    return -(-a // b)


def _qwk_partial_kernel(logits_ref, labels_ref, out_ref, acc_ref):
    """Accumulates per-lane partial sums along the sample axis.

    logits_ref : [C, TILE_N] f32  (classes on sublanes, samples on lanes)
    labels_ref : [1, TILE_N] i32  (-1 marks padding)
    out_ref    : [8, 128]    f32  per-core partial sums (broadcast over lanes)
    acc_ref    : [8, TILE_N] f32  scratch accumulator
        row 0: sum valid                     (hist_true 0th moment)
        row 1: sum valid * label             (hist_true 1st moment)
        row 2: sum valid * label^2           (hist_true 2nd moment)
        row 3: sum_c probs                   (hist_pred 0th moment == Conf.sum)
        row 4: sum_c c   * probs             (hist_pred 1st moment)
        row 5: sum_c c^2 * probs             (hist_pred 2nd moment)
        row 6: sum_c (label-c)^2 * probs     (un-normalized numerator)
        row 7: unused
    """
    j = pl.program_id(1)

    @pl.when(j == 0)
    def _():
        acc_ref[...] = jnp.zeros_like(acc_ref)

    logits = logits_ref[...]                          # [C, T] f32
    labels = labels_ref[...]                          # [1, T] i32
    c, t = logits.shape

    # Numerically stable softmax over the class (sublane) axis.
    m = jnp.max(logits, axis=0, keepdims=True)        # [1, T]
    e = jnp.exp(logits - m)                           # [C, T] (EUP)
    s = jnp.sum(e, axis=0, keepdims=True)             # [1, T]
    probs = e / s                                     # exact divide (accuracy)

    # Validity mask: padded columns carry label == -1.
    valid = jnp.logical_and(labels >= 0, labels < c).astype(jnp.float32)  # [1,T]
    lf = labels.astype(jnp.float32)                   # [1, T]

    probs_m = probs * valid                           # zero padded columns

    # Class index per sublane.
    cidx = lax.broadcasted_iota(jnp.int32, (c, t), 0).astype(jnp.float32)

    p0 = jnp.sum(probs_m, axis=0, keepdims=True)              # [1, T]
    p1 = jnp.sum(cidx * probs_m, axis=0, keepdims=True)       # [1, T]
    p2 = jnp.sum(cidx * cidx * probs_m, axis=0, keepdims=True)

    # Per-sample numerator contribution: sum_c (label - c)^2 * prob_c
    num_lane = lf * lf * p0 - 2.0 * lf * p1 + p2              # [1, T]

    acc_ref[0:1, :] += valid
    acc_ref[1:2, :] += valid * lf
    acc_ref[2:3, :] += valid * lf * lf
    acc_ref[3:4, :] += p0
    acc_ref[4:5, :] += p1
    acc_ref[5:6, :] += p2
    acc_ref[6:7, :] += num_lane

    @pl.when(j == pl.num_programs(1) - 1)
    def _():
        red = jnp.sum(acc_ref[...], axis=1, keepdims=True)    # [8, 1]
        out_ref[...] = jnp.broadcast_to(red, out_ref.shape)   # [8, 128]


def qwk_loss(logits, labels, scale=2.0, tile_n_max=TILE_N_MAX):
    """logits: [N, NUM_CLASSES] float; labels: [N] (or [N,1]) int class ids.

    Precondition (as in the PyTorch path): labels must lie in [0, NUM_CLASSES).
    """
    logits = jnp.asarray(logits, jnp.float32)
    n, c = logits.shape
    assert c == NUM_CLASSES
    labels = jnp.asarray(labels).reshape(-1).astype(jnp.int32)

    # Layout plumbing (wrapper-side): classes on sublanes, samples on lanes.
    logits_t = logits.T                                       # [C, N]
    labels_row = labels.reshape(1, n)                         # [1, N]

    n128 = _cdiv(n, 128) * 128
    tile_n = min(tile_n_max, n128)
    steps = max(1, _cdiv(n, N_CORE_SPLIT * tile_n))           # steps per core
    n_pad = N_CORE_SPLIT * steps * tile_n

    logits_t = jnp.pad(logits_t, ((0, 0), (0, n_pad - n)))
    labels_row = jnp.pad(labels_row, ((0, 0), (0, n_pad - n)),
                         constant_values=-1)

    partials = pl.pallas_call(
        _qwk_partial_kernel,
        out_shape=jax.ShapeDtypeStruct((N_CORE_SPLIT * 8, 128), jnp.float32),
        grid_spec=pltpu.PrefetchScalarGridSpec(
            num_scalar_prefetch=0,
            grid=(N_CORE_SPLIT, steps),
            in_specs=[
                pl.BlockSpec((NUM_CLASSES, tile_n),
                             lambda core, j: (0, core * steps + j)),
                pl.BlockSpec((1, tile_n),
                             lambda core, j: (0, core * steps + j)),
            ],
            out_specs=pl.BlockSpec((8, 128), lambda core, j: (core, 0)),
            scratch_shapes=[pltpu.VMEM((8, tile_n), jnp.float32)],
        ),
        compiler_params=pltpu.CompilerParams(
            dimension_semantics=("parallel", "arbitrary")),
    )(logits_t, labels_row)

    # Tiny scalar epilogue in JAX (combine the two per-core partial sums).
    sums = partials[0:8, 0] + partials[8:16, 0]               # [8]
    t0, t1, t2 = sums[0], sums[1], sums[2]                    # hist_true moments
    p0, p1, p2 = sums[3], sums[4], sums[5]                    # hist_pred moments
    num_raw = sums[6]

    inv_sq = jnp.float32(1.0 / (NUM_CLASSES - 1) ** 2)
    num = num_raw * inv_sq                                    # sum(W * Conf)
    den = (t2 * p0 - 2.0 * t1 * p1 + t0 * p2) * inv_sq / p0   # sum(W * E)
    qwk = 1.0 - num / (den + jnp.float32(EPS))
    # loss = -log(sigmoid(scale*qwk)) = softplus(-scale*qwk), computed stably.
    return jax.nn.softplus(-jnp.float32(scale) * qwk)


def _qwk_loss_ref(logits, labels, scale=2.0):
    """Pure-JAX reference mirroring the PyTorch code (for verification)."""
    output = jax.nn.softmax(logits.astype(jnp.float32), axis=1)
    target = jax.nn.one_hot(labels.reshape(-1), NUM_CLASSES, dtype=jnp.float32)
    c = NUM_CLASSES
    w = jnp.arange(c, dtype=jnp.float32) / (c - 1)
    W = (w[None, :] - w[:, None]) ** 2
    C_conf = (output.T @ target).T
    hist_true = jnp.sum(target, axis=0)[:, None]
    hist_pred = jnp.sum(output, axis=0)[:, None]
    E = (hist_true @ hist_pred.T) / jnp.sum(C_conf)
    qwk = 1.0 - jnp.sum(W * C_conf) / (jnp.sum(W * E) + EPS)
    return -jnp.log(jax.nn.sigmoid(scale * qwk))


if __name__ == "__main__":
    key = jax.random.PRNGKey(0)
    k1, k2, k3, k4 = jax.random.split(key, 4)

    # Primary small case.
    N = 8
    logits = jax.random.normal(k1, (N, NUM_CLASSES), dtype=jnp.float32)
    labels = jax.random.randint(k2, (N,), 0, NUM_CLASSES, dtype=jnp.int32)
    loss = jax.block_until_ready(qwk_loss(logits, labels, scale=2.0))
    ref = jax.block_until_ready(_qwk_loss_ref(logits, labels, scale=2.0))
    np.testing.assert_allclose(np.asarray(loss), np.asarray(ref),
                               rtol=1e-5, atol=1e-5)

    # Second case: exercises padding, the multi-step grid and the 2-way split.
    N2 = 333
    logits2 = jax.random.normal(k3, (N2, NUM_CLASSES), dtype=jnp.float32)
    labels2 = jax.random.randint(k4, (N2,), 0, NUM_CLASSES, dtype=jnp.int32)
    loss2 = jax.block_until_ready(qwk_loss(logits2, labels2, scale=2.0,
                                           tile_n_max=128))
    ref2 = jax.block_until_ready(_qwk_loss_ref(logits2, labels2, scale=2.0))
    np.testing.assert_allclose(np.asarray(loss2), np.asarray(ref2),
                               rtol=1e-5, atol=1e-5)

    print("KERNEL_OK")
</pallas_src>

<mosaic_0001>
module attributes {stable_mosaic.version = 11 : i64} {
  func.func @_qwk_partial_kernel(%arg0: i32, %arg1: i32, %arg2: memref<6x128xf32, #tpu.memory_space<vmem>>, %arg3: memref<1x128xi32, #tpu.memory_space<vmem>>, %arg4: memref<8x128xf32, #tpu.memory_space<vmem>>, %arg5: memref<8x128xf32, #tpu.memory_space<vmem>>) attributes {dimension_semantics = [#tpu.dimension_semantics<parallel>, #tpu.dimension_semantics<arbitrary>], iteration_bounds = array<i64: 2, 1>, scalar_prefetch = 0 : i64, scratch_operands = 1 : i64, tpu.core_type = #tpu.core_type<tc>, window_params = [{transform_indices = @transform_0, window_bounds = array<i64: 6, 128>}, {transform_indices = @transform_1, window_bounds = array<i64: 1, 128>}, {transform_indices = @transform_2, window_bounds = array<i64: 8, 128>}]} {
    %c0_i32 = arith.constant 0 : i32
    %0 = arith.cmpi eq, %arg1, %c0_i32 : i32
    %1 = arith.extui %0 : i1 to i32
    %c0_i32_0 = arith.constant 0 : i32
    %2 = arith.cmpi ne, %1, %c0_i32_0 : i32
    scf.if %2 {
      %cst_34 = arith.constant 0.000000e+00 : f32
      %69 = vector.broadcast %cst_34 : f32 to vector<8x128xf32>
      %c0_35 = arith.constant 0 : index
      %c0_36 = arith.constant 0 : index
      %70 = vector.load %arg5[%c0_35, %c0_36] : memref<8x128xf32, #tpu.memory_space<vmem>>, vector<8x128xf32>
      tpu.vector_store %arg5[%c0_35, %c0_36], %69 {strides = array<i32>} : memref<8x128xf32, #tpu.memory_space<vmem>>, vector<8x128xf32>,
    } else {
    }
    %c0 = arith.constant 0 : index
    %c0_1 = arith.constant 0 : index
    %3 = vector.load %arg2[%c0, %c0_1] : memref<6x128xf32, #tpu.memory_space<vmem>>, vector<6x128xf32>
    %c0_2 = arith.constant 0 : index
    %c0_3 = arith.constant 0 : index
    %4 = vector.load %arg3[%c0_2, %c0_3] : memref<1x128xi32, #tpu.memory_space<vmem>>, vector<1x128xi32>
    %cst = arith.constant dense<0xFF800000> : vector<128xf32>
    %5 = vector.multi_reduction <maximumf>, %3, %cst [0] : vector<6x128xf32> to vector<128xf32>
    %6 = vector.shape_cast %5 : vector<128xf32> to vector<1x128xf32>
    %7 = vector.broadcast %6 : vector<1x128xf32> to vector<6x128xf32>
    %8 = arith.subf %3, %7 : vector<6x128xf32>
    %9 = math.exp %8 : vector<6x128xf32>
    %cst_4 = arith.constant dense<0.000000e+00> : vector<128xf32>
    %10 = vector.multi_reduction <add>, %9, %cst_4 [0] : vector<6x128xf32> to vector<128xf32>
    %11 = vector.shape_cast %10 : vector<128xf32> to vector<1x128xf32>
    %12 = vector.broadcast %11 : vector<1x128xf32> to vector<6x128xf32>
    %13 = arith.divf %9, %12 : vector<6x128xf32>
    %c0_i32_5 = arith.constant 0 : i32
    %14 = vector.broadcast %c0_i32_5 : i32 to vector<1x128xi32>
    %15 = arith.cmpi sge, %4, %14 : vector<1x128xi32>
    %c6_i32 = arith.constant 6 : i32
    %16 = vector.broadcast %c6_i32 : i32 to vector<1x128xi32>
    %17 = arith.cmpi slt, %4, %16 : vector<1x128xi32>
    %18 = arith.andi %15, %17 : vector<1x128xi1>
    %19 = arith.extui %18 : vector<1x128xi1> to vector<1x128xi32>
    %20 = arith.sitofp %19 : vector<1x128xi32> to vector<1x128xf32>
    %21 = arith.sitofp %4 : vector<1x128xi32> to vector<1x128xf32>
    %22 = vector.broadcast %20 : vector<1x128xf32> to vector<6x128xf32>
    %23 = arith.mulf %13, %22 : vector<6x128xf32>
    %24 = tpu.iota {dimensions = array<i32: 0>} : vector<6x128xi32>
    %25 = arith.sitofp %24 : vector<6x128xi32> to vector<6x128xf32>
    %cst_6 = arith.constant dense<0.000000e+00> : vector<128xf32>
    %26 = vector.multi_reduction <add>, %23, %cst_6 [0] : vector<6x128xf32> to vector<128xf32>
    %27 = vector.shape_cast %26 : vector<128xf32> to vector<1x128xf32>
    %28 = arith.mulf %25, %23 : vector<6x128xf32>
    %cst_7 = arith.constant dense<0.000000e+00> : vector<128xf32>
    %29 = vector.multi_reduction <add>, %28, %cst_7 [0] : vector<6x128xf32> to vector<128xf32>
    %30 = vector.shape_cast %29 : vector<128xf32> to vector<1x128xf32>
    %31 = arith.mulf %25, %25 : vector<6x128xf32>
    %32 = arith.mulf %31, %23 : vector<6x128xf32>
    %cst_8 = arith.constant dense<0.000000e+00> : vector<128xf32>
    %33 = vector.multi_reduction <add>, %32, %cst_8 [0] : vector<6x128xf32> to vector<128xf32>
    %34 = vector.shape_cast %33 : vector<128xf32> to vector<1x128xf32>
    %35 = arith.mulf %21, %21 : vector<1x128xf32>
    %36 = arith.mulf %35, %27 : vector<1x128xf32>
    %cst_9 = arith.constant 2.000000e+00 : f32
    %37 = vector.broadcast %cst_9 : f32 to vector<1x128xf32>
    %38 = arith.mulf %37, %21 : vector<1x128xf32>
    %39 = arith.mulf %38, %30 : vector<1x128xf32>
    %40 = arith.subf %36, %39 : vector<1x128xf32>
    %41 = arith.addf %40, %34 : vector<1x128xf32>
    %c0_10 = arith.constant 0 : index
    %c0_11 = arith.constant 0 : index
    %42 = vector.load %arg5[%c0_10, %c0_11] : memref<8x128xf32, #tpu.memory_space<vmem>>, vector<1x128xf32>
    %43 = arith.addf %42, %20 : vector<1x128xf32>
    %c0_12 = arith.constant 0 : index
    %c0_13 = arith.constant 0 : index
    %44 = vector.load %arg5[%c0_12, %c0_13] : memref<8x128xf32, #tpu.memory_space<vmem>>, vector<1x128xf32>
    tpu.vector_store %arg5[%c0_12, %c0_13], %43 {strides = array<i32>} : memref<8x128xf32, #tpu.memory_space<vmem>>, vector<1x128xf32>,
    %c1 = arith.constant 1 : index
    %c0_14 = arith.constant 0 : index
    %45 = vector.load %arg5[%c1, %c0_14] : memref<8x128xf32, #tpu.memory_space<vmem>>, vector<1x128xf32>
    %46 = arith.mulf %20, %21 : vector<1x128xf32>
    %47 = arith.addf %45, %46 : vector<1x128xf32>
    %c1_15 = arith.constant 1 : index
    %c0_16 = arith.constant 0 : index
    %48 = vector.load %arg5[%c1_15, %c0_16] : memref<8x128xf32, #tpu.memory_space<vmem>>, vector<1x128xf32>
    tpu.vector_store %arg5[%c1_15, %c0_16], %47 {strides = array<i32>} : memref<8x128xf32, #tpu.memory_space<vmem>>, vector<1x128xf32>,
    %c2 = arith.constant 2 : index
    %c0_17 = arith.constant 0 : index
    %49 = vector.load %arg5[%c2, %c0_17] : memref<8x128xf32, #tpu.memory_space<vmem>>, vector<1x128xf32>
    %50 = arith.mulf %20, %21 : vector<1x128xf32>
    %51 = arith.mulf %50, %21 : vector<1x128xf32>
    %52 = arith.addf %49, %51 : vector<1x128xf32>
    %c2_18 = arith.constant 2 : index
    %c0_19 = arith.constant 0 : index
    %53 = vector.load %arg5[%c2_18, %c0_19] : memref<8x128xf32, #tpu.memory_space<vmem>>, vector<1x128xf32>
    tpu.vector_store %arg5[%c2_18, %c0_19], %52 {strides = array<i32>} : memref<8x128xf32, #tpu.memory_space<vmem>>, vector<1x128xf32>,
    %c3 = arith.constant 3 : index
    %c0_20 = arith.constant 0 : index
    %54 = vector.load %arg5[%c3, %c0_20] : memref<8x128xf32, #tpu.memory_space<vmem>>, vector<1x128xf32>
    %55 = arith.addf %54, %27 : vector<1x128xf32>
    %c3_21 = arith.constant 3 : index
    %c0_22 = arith.constant 0 : index
    %56 = vector.load %arg5[%c3_21, %c0_22] : memref<8x128xf32, #tpu.memory_space<vmem>>, vector<1x128xf32>
    tpu.vector_store %arg5[%c3_21, %c0_22], %55 {strides = array<i32>} : memref<8x128xf32, #tpu.memory_space<vmem>>, vector<1x128xf32>,
    %c4 = arith.constant 4 : index
    %c0_23 = arith.constant 0 : index
    %57 = vector.load %arg5[%c4, %c0_23] : memref<8x128xf32, #tpu.memory_space<vmem>>, vector<1x128xf32>
    %58 = arith.addf %57, %30 : vector<1x128xf32>
    %c4_24 = arith.constant 4 : index
    %c0_25 = arith.constant 0 : index
    %59 = vector.load %arg5[%c4_24, %c0_25] : memref<8x128xf32, #tpu.memory_space<vmem>>, vector<1x128xf32>
    tpu.vector_store %arg5[%c4_24, %c0_25], %58 {strides = array<i32>} : memref<8x128xf32, #tpu.memory_space<vmem>>, vector<1x128xf32>,
    %c5 = arith.constant 5 : index
    %c0_26 = arith.constant 0 : index
    %60 = vector.load %arg5[%c5, %c0_26] : memref<8x128xf32, #tpu.memory_space<vmem>>, vector<1x128xf32>
    %61 = arith.addf %60, %34 : vector<1x128xf32>
    %c5_27 = arith.constant 5 : index
    %c0_28 = arith.constant 0 : index
    %62 = vector.load %arg5[%c5_27, %c0_28] : memref<8x128xf32, #tpu.memory_space<vmem>>, vector<1x128xf32>
    tpu.vector_store %arg5[%c5_27, %c0_28], %61 {strides = array<i32>} : memref<8x128xf32, #tpu.memory_space<vmem>>, vector<1x128xf32>,
    %c6 = arith.constant 6 : index
    %c0_29 = arith.constant 0 : index
    %63 = vector.load %arg5[%c6, %c0_29] : memref<8x128xf32, #tpu.memory_space<vmem>>, vector<1x128xf32>
    %64 = arith.addf %63, %41 : vector<1x128xf32>
    %c6_30 = arith.constant 6 : index
    %c0_31 = arith.constant 0 : index
    %65 = vector.load %arg5[%c6_30, %c0_31] : memref<8x128xf32, #tpu.memory_space<vmem>>, vector<1x128xf32>
    tpu.vector_store %arg5[%c6_30, %c0_31], %64 {strides = array<i32>} : memref<8x128xf32, #tpu.memory_space<vmem>>, vector<1x128xf32>,
    %c0_i32_32 = arith.constant 0 : i32
    %66 = arith.cmpi eq, %arg1, %c0_i32_32 : i32
    %67 = arith.extui %66 : i1 to i32
    %c0_i32_33 = arith.constant 0 : i32
    %68 = arith.cmpi ne, %67, %c0_i32_33 : i32
    scf.if %68 {
      %c0_34 = arith.constant 0 : index
      %c0_35 = arith.constant 0 : index
      %69 = vector.load %arg5[%c0_34, %c0_35] : memref<8x128xf32, #tpu.memory_space<vmem>>, vector<8x128xf32>
      %cst_36 = arith.constant dense<0.000000e+00> : vector<8xf32>
      %70 = vector.multi_reduction <add>, %69, %cst_36 [1] : vector<8x128xf32> to vector<8xf32>
      %71 = vector.shape_cast %70 : vector<8xf32> to vector<8x1xf32>
      %72 = vector.shape_cast %71 : vector<8x1xf32> to vector<8x1xf32>
      %73 = vector.broadcast %72 : vector<8x1xf32> to vector<8x128xf32>
      %c0_37 = arith.constant 0 : index
      %c0_38 = arith.constant 0 : index
      %74 = vector.load %arg4[%c0_37, %c0_38] : memref<8x128xf32, #tpu.memory_space<vmem>>, vector<8x128xf32>
      tpu.vector_store %arg4[%c0_37, %c0_38], %73 {strides = array<i32>} : memref<8x128xf32, #tpu.memory_space<vmem>>, vector<8x128xf32>,
    } else {
    }
    return
  }
  func.func @transform_0(%arg0: i32, %arg1: i32) -> (i32, i32) {
    %c1_i32 = arith.constant 1 : i32
    %0 = arith.muli %arg0, %c1_i32 : i32
    %1 = arith.addi %0, %arg1 : i32
    %c0_i32 = arith.constant 0 : i32
    %c0_i32_0 = arith.constant 0 : i32
    return %c0_i32, %1 : i32, i32
  }
  func.func @transform_1(%arg0: i32, %arg1: i32) -> (i32, i32) {
    %c1_i32 = arith.constant 1 : i32
    %0 = arith.muli %arg0, %c1_i32 : i32
    %1 = arith.addi %0, %arg1 : i32
    %c0_i32 = arith.constant 0 : i32
    %c0_i32_0 = arith.constant 0 : i32
    return %c0_i32, %1 : i32, i32
  }
  func.func @transform_2(%arg0: i32, %arg1: i32) -> (i32, i32) {
    %c0_i32 = arith.constant 0 : i32
    %c0_i32_0 = arith.constant 0 : i32
    return %arg0, %c0_i32 : i32, i32
  }
}

</mosaic_0001>

<bundles_post_ra>
// kernel: tpu_custom_call.1
= control target key start
LH: loop header
LB: loop body
LE: loop exit
PB: predicated region body
PF: predicated region fallthrough
CT: control target
= control target key end

     0   :  { %7 = vsyncpa [#allocation4], 0  ;;  %s800_s0 = inlined_call_operand.hbm [shape: f32[6,256], index: 0, kind: input, shape index: {}]   ;;  %s801_s1 = inlined_call_operand.vmem [shape: s32[1,256], index: 1, kind: input, shape index: {}]   ;;  %s802_s2 = inlined_call_operand.hbm [shape: f32[16,128], index: 2, kind: output, shape index: {}]  }
   0x1   :  { %9 = vsyncpa [#allocation4 + $0x1], 0 }
   0x2   :  { %10 = vsyncpa [#allocation5], 0 }
   0x3   :  { %12 = vsyncpa [#allocation5 + $0x1], 0  ;;  %s614_s9 = smov 0   ;;  %s616_s10 = smov 0  }
   0x4   :  { %s618_s11 = smov 0   ;;  %s620_s12 = smov 0  }
   0x5   :  { %s622_s13 = smov 0   ;;  %s624_s14 = smov 0  }
   0x6 LB: > { %s401_s15 = sadd.s32 4294967295, %s594_s14   ;;  %s402_s16 = sadd.s32 4294967294, %s594_s14   ;;  %s594_s14 = sphi %s624_s14, %s18_s14   ;;  %s590_s13 = sphi %s622_s13, %s818_s13   ;;  %s586_s12 = sphi %s620_s12, %s817_s12   ;;  %s582_s11 = sphi %s618_s11, %s816_s11   ;;  %s578_s10 = sphi %s616_s10, %s815_s10   ;;  %s574_s9 = sphi %s614_s9, %s814_s9  }
   0x7   : > { %s30_s17 = sadd.s32 1, %s590_s13  ;;  %s39_s18 = sadd.s32 1, %s582_s11 }
   0x8   : > { %p32_p0 = scmp.ge.s32.totalorder %s30_s17, 2  ;;  %p46_p1 = scmp.ne.s32.totalorder %s582_s11, %s578_s10 }
   0x9   : > { %p47_p2 = scmp.eq.s32.totalorder %s594_s14, 0  ;;  %p52_p3 = scmp.ne.s32.totalorder %s578_s10, %s574_s9 }
   0xa   : > { %s820_s17 = smov (%p32_p0, %s30_s17), 0  ;;  %p53_p5 = scmp.eq.s32.totalorder %s401_s15, 0 }
   0xb   : > { %p655_p4 = por %p47_p2, %p46_p1  ;;  %s36_s20 = ssub.s32 %s590_s13, %s820_s17 }
   0xc   : > { %p104_p6 = scmp.eq.s32.totalorder %s401_s15, 1  ;;  %p37_p7 = scmp.eq.s32.totalorder %s36_s20, 0 }
   0xd   : > { %p661_p8 = por %p53_p5, %p52_p3  ;;  %p110_p10 = scmp.eq.s32.totalorder %s402_s16, 1 }
   0xe   : > { %p665_p9 = por %p104_p6, %p46_p1  ;;  %p427_p13 = scmp.lt.s32.totalorder %s594_s14, 2 }
   0xf   : > { %s670_s23 = scalar_select %p37_p7, %s582_s11, %s39_s18  }
  0x10   : > { %s806_s22 = scalar_select %p665_p9, 1, 0 }
  0x11   : > { %p672_p11 = por %p110_p10, %p52_p3  ;;  %s130_s25 = sand.u32 1, %s582_s11  }
  0x12   : > { %s405_s26 = sshll.u32 %s130_s25, 3  ;;  %s406_s27 = sshll.u32 %s590_s13, 7 }
  0x13   : > { %s807_s24 = scalar_select %p672_p11, 1, 0 }
  0x14   : > { %s683_s30 = scalar_lea.hbm %s800_s0, %s406_s27  ;;  %s134_s3 = scalar_lea.vmem [#allocation3], %s405_s26 }
  0x15   : > { %s142_s4 = sshll.u32 %s134_s3, 4  ;;  %p689_p0 = pnand %p427_p13, %p655_p4  ;;  %s685_s4 = int_to_ptr.vmem [resolvable:$true] %s142_s4 }
  0x16   : > { %s131_s6 = scalar_lea.sflag [#allocation4], %s130_s25  ;;  %s482_s7 = scalar_lea.hbm %s683_s30, 128 }
  0x17   : > { %p483_p3 = scmp.ne.s32.totalorder %s683_s30, %s482_s7  ;;  %p484_p5 = pneg %p689_p0 }
  0x18   : > { %s487_s16 = scalar_lea.hbm %s800_s0, 256  ;;  %p488_p4 = scmp.lt.u32.totalorder %s683_s30, %s800_s0 }
  0x19   : > { %p485_p6 = pnand %p484_p5, %p483_p3  ;;  %p489_p10 = scmp.lt.u32.totalorder %s487_s16, %s482_s7 }
  0x1a   : > { %p491_p12 = scmp.lt.u32.totalorder %s482_s7, %s683_s30 }
  0x1b   : > { %p486_p7 = pneg %p485_p6  ;;  %p490_p13 = por %p489_p10, %p488_p4 }
  0x1d   : > { %p492_p1 = por %p491_p12, %p490_p13 }
  0x1f   : > { %p493_p2 = pnand %p492_p1, %p486_p7 }
  0x21   : > { %496 = shalt.err (!%p493_p2)
}
  0x22   : > { %s497_s20 = scalar_lea.vmem %s685_s4, 128  ;;  %s596_s25 = smov [#allocation3]  }
  0x23   : > { %p498_p3 = scmp.ne.s32.totalorder %s685_s4, %s497_s20  ;;  %s502_s26 = sshll.u32 %s596_s25, 4  ;;  %s503_s26 = int_to_ptr.vmem [resolvable:$false] %s502_s26 }
  0x24   : > { %s504_s27 = scalar_lea.vmem %s503_s26, 256  ;;  %p505_p9 = scmp.lt.s32.totalorder %s685_s4, %s503_s26 }
  0x25   : > { %p500_p6 = pnand %p498_p3, %p484_p5  ;;  %p506_p4 = scmp.lt.s32.totalorder %s504_s27, %s497_s20 }
  0x27   : > { %p501_p11 = pneg %p500_p6  ;;  %p507_p10 = por %p506_p4, %p505_p9 }
  0x29   : > { %p508_p12 = pnand %p507_p10, %p501_p11 }
  0x2b   : > { %511 = shalt.err (!%p508_p12)
}
  0x2c   : > { %422 = dma.hbm_to_vmem [thread:$0]  (!%p689_p0), %s683_s30, 128, %s685_s4, %s131_s6  }
  0x2d   : > { %p809_p1 = scmp.lt.s32.totalorder %s594_s14, 3  ;;  %p810_p2 = scmp.ge.s32.totalorder %s594_s14, 1 }
  0x2f   : > { %p156_p5 = pnand %p810_p2, %p809_p1 }
  0x30   : > { %s725_s28 = sand.u32 (!%p156_p5), 1, %s578_s10  }
  0x31   : > { %159 = sbr.rel (%p156_p5) target bundleno = 301 (0x12d), region = 28  ;;  %s408_s29 = sshll.u32 (!%p156_p5), %s725_s28, 3 }
  0x32   : > { %s162_s3 = scalar_lea.sflag (!%p156_p5), [#allocation4], %s725_s28  ;;  %s165_s5 = scalar_lea.vmem (!%p156_p5), [#allocation3], %s408_s29 }
  0x38   : > { %565 = dma.done.wait (%p661_p8), %s162_s3, 128  }
  0x39   : > { %567 = vsyncadd (%p661_p8), %s162_s3, 4294967168  ;;  %p192_p9 = scmp.lt.s32.totalorder %s586_s12, 1  ;;  %v597_v0 = vmov 0.0   ;;  %vm203_vm0 = vcmask 1045504   ;;  %v201_v1 = vld [vmem:[%s165_s5] sm:$0x3f]  ;;  %v230_v29 = vlaneseq }
  0x3a   : > { %200 = vst [vmem:[#allocation2] sm:$0xff] %v597_v0  ;;  %v204_v3 = vsel %vm203_vm0, %v201_v1, -inf  ;;  %s189_s21 = scalar_lea.vmem [#allocation6], %s408_s29  ;;  %s412_s15 = sshll.u32 %s586_s12, 7 }
  0x3b   : > { %s193_s30 = scalar_select %p192_p9, %s586_s12, 1  ;;  %v205_v5 = vrot.slane %v204_v3, 4  ;;  %v231_v31 = vshrl.u32 %v230_v29, 7 }
  0x3c   : > { %s313_s8 = sshll.u32 %s189_s21, 4  ;;  %s753_s19 = scalar_lea.hbm %s802_s2, %s412_s15  ;;  %s748_s8 = int_to_ptr.vmem [resolvable:$true] %s313_s8 }
  0x3d   : > { %s194_s7 = scalar_lea.vmem %s801_s1, %s193_s30  ;;  %v206_v9 = vmax.f32 %v204_v3, %v205_v5  ;;  %v232_v32 = vsub.s32 0, %v231_v31  ;;  %v238_v34 = vcvt.s32.f32 %v231_v31  ;;  %s300_s20 = scalar_lea.sflag [#allocation5], %s725_s28 }
  0x3e   : > { %v202_v2 = vld [vmem:[%s194_s7] sm:$0x1]  ;;  %s512_s25 = scalar_lea.vmem %s748_s8, 128  ;;  %p811_p11 = scmp.ne.s32.totalorder %s806_s22, 0 }
  0x3f   : > { %vm223_vm1 = vcmp.ge.s32.totalorder %v202_v2, 0  ;;  %vm224_vm2 = vcmp.lt.s32.totalorder %v202_v2, 6  ;;  %v228_v6 = vcvt.s32.f32 %v202_v2  ;;  %v207_v13 = vrot.slane %v206_v9, 2  ;;  %p513_p8 = scmp.ne.s32.totalorder %s748_s8, %s512_s25  ;;  %s598_s26 = smov [#allocation6]  }
  0x40   : > { %vm225_vm3 = vmand %vm223_vm1, %vm224_vm2  ;;  %v254_v37 = vmul.f32 %v238_v34, %v238_v34  ;;  %s516_s12 = sshll.u32 %s598_s26, 4  ;;  %s517_s12 = int_to_ptr.vmem [resolvable:$false] %s516_s12 }
  0x41   : > { %v269_v4 = vld [vmem:[#allocation2] sm:$0x1]  ;;  %v410_v7 = vsel %vm225_vm3, 1.0, %v597_v0  ;;  %v272_v8 = vld [vmem:[#allocation2 + $0x1] sm:$0x1]  ;;  %v208_v16 = vmax.f32 %v206_v9, %v207_v13  ;;  %v263_v57 = vmul.f32 %v228_v6, %v228_v6  ;;  %v265_v62 = vmul.f32 2.0, %v228_v6  ;;  %p514_p0 = pnand %p513_p8, %p811_p11  ;;  %p519_p13 = scmp.lt.s32.totalorder %s748_s8, %s517_s12 }
  0x42   : > { %v270_v10 = vadd.f32 %v410_v7, %v269_v4  ;;  %v273_v11 = vmul.f32 %v410_v7, %v228_v6  ;;  %v276_v12 = vld [vmem:[#allocation2 + $0x2] sm:$0x1]  ;;  %v233_v33 = vrot.slane %v410_v7, %v232_v32  ;;  %v280_v58 = vld [vmem:[#allocation2 + $0x3] sm:$0x1]  ;;  %v283_v63 = vld [vmem:[#allocation2 + $0x4] sm:$0x1] }
  0x43   : > { %v209_v18 = vrot.slane %v208_v16, 1  ;;  %v286_v0 = vld [vmem:[#allocation2 + $0x5] sm:$0x1]  ;;  %p515_p7 = pneg %p514_p0  ;;  %s518_s27 = scalar_lea.vmem %s517_s12, 256 }
  0x44   : > { %271 = vst [vmem:[#allocation2] sm:$0x1] %v270_v10  ;;  %v274_v14 = vadd.f32 %v273_v11, %v272_v8  ;;  %v277_v15 = vmul.f32 %v273_v11, %v228_v6  ;;  %v289_v10 = vld [vmem:[#allocation2 + $0x6] sm:$0x1]  ;;  %p520_p3 = scmp.lt.s32.totalorder %s518_s27, %s512_s25 }
  0x45   : > { %v210_v19 = vmax.f32 %v208_v16, %v209_v18 }
  0x46   : > { %275 = vst [vmem:[#allocation2 + $0x1] sm:$0x1] %v274_v14  ;;  %v278_v17 = vadd.f32 %v277_v15, %v276_v12  ;;  %p521_p6 = por %p520_p3, %p519_p13 }
  0x47   : > { %v211_v20 = vsub.f32 %v201_v1, %v210_v19 }
  0x48   : > { %279 = vst [vmem:[#allocation2 + $0x2] sm:$0x1] %v278_v17  ;;  %p522_p4 = pnand %p521_p6, %p515_p7 }
  0x49   : > { %v212_v21 = vmul.f32 1.442695, %v211_v20 }
  0x4b   : > { %478 = vpow2.f32 %v212_v21 }
  0x55   : > { %v479_v22 = vpop.eup %478 }
  0x56   : > { %v214_v23 = vsel %vm203_vm0, %v479_v22, 0.0 }
  0x57   : > { %v215_v24 = vrot.slane %v214_v23, 4 }
  0x59   : > { %v216_v25 = vadd.f32 %v215_v24, %v214_v23 }
  0x5b   : > { %v217_v26 = vrot.slane %v216_v25, 2 }
  0x5d   : > { %v218_v27 = vadd.f32 %v217_v26, %v216_v25 }
  0x5f   : > { %v219_v28 = vrot.slane %v218_v27, 1 }
  0x61   : > { %v220_v30 = vadd.f32 %v219_v28, %v218_v27 }
  0x63   : > { %480 = vrcp.f32 %v220_v30 }
  0x6d   : > { %v481_v35 = vpop.eup %480 }
  0x6e   : > { %v222_v36 = vmul.f32 %v481_v35, %v479_v22 }
  0x70   : > { %v235_v38 = vmul.f32 %v233_v33, %v222_v36 }
  0x72   : > { %v239_v39 = vsel %vm203_vm0, %v235_v38, 0.0  ;;  %v246_v40 = vmul.f32 %v238_v34, %v235_v38  ;;  %v255_v41 = vmul.f32 %v254_v37, %v235_v38 }
  0x73   : > { %v240_v42 = vrot.slane %v239_v39, 4 }
  0x74   : > { %v247_v43 = vsel %vm203_vm0, %v246_v40, 0.0  ;;  %v256_v44 = vsel %vm203_vm0, %v255_v41, 0.0 }
  0x75   : > { %v241_v45 = vadd.f32 %v240_v42, %v239_v39  ;;  %v248_v46 = vrot.slane %v247_v43, 4  ;;  %v257_v47 = vrot.slane %v256_v44, 4 }
  0x77   : > { %v242_v48 = vrot.slane %v241_v45, 2  ;;  %v249_v49 = vadd.f32 %v248_v46, %v247_v43  ;;  %v258_v50 = vadd.f32 %v257_v47, %v256_v44 }
  0x79   : > { %v243_v51 = vadd.f32 %v242_v48, %v241_v45  ;;  %v250_v52 = vrot.slane %v249_v49, 2  ;;  %v259_v53 = vrot.slane %v258_v50, 2 }
  0x7b   : > { %v244_v54 = vrot.slane %v243_v51, 1  ;;  %v251_v55 = vadd.f32 %v250_v52, %v249_v49  ;;  %v260_v56 = vadd.f32 %v259_v53, %v258_v50 }
  0x7d   : > { %v245_v59 = vadd.f32 %v244_v54, %v243_v51  ;;  %v252_v60 = vrot.slane %v251_v55, 1  ;;  %v261_v61 = vrot.slane %v260_v56, 1 }
  0x7f   : > { %v253_v1 = vadd.f32 %v252_v60, %v251_v55  ;;  %v262_v2 = vadd.f32 %v261_v61, %v260_v56  ;;  %v264_v3 = vmul.f32 %v263_v57, %v245_v59  ;;  %v281_v4 = vadd.f32 %v280_v58, %v245_v59 }
  0x81   : > { %v266_v5 = vmul.f32 %v265_v62, %v253_v1  ;;  %282 = vst [vmem:[#allocation2 + $0x3] sm:$0x1] %v281_v4  ;;  %v284_v7 = vadd.f32 %v283_v63, %v253_v1  ;;  %v287_v8 = vadd.f32 %v286_v0, %v262_v2 }
  0x83   : > { %v267_v9 = vsub.f32 %v264_v3, %v266_v5  ;;  %285 = vst [vmem:[#allocation2 + $0x4] sm:$0x1] %v284_v7  ;;  %288 = vst [vmem:[#allocation2 + $0x5] sm:$0x1] %v287_v8 }
  0x85   : > { %v268_v11 = vadd.f32 %v267_v9, %v262_v2 }
  0x87   : > { %v290_v6 = vadd.f32 %v289_v10, %v268_v11 }
  0x89   : > { %291 = vst [vmem:[#allocation2 + $0x6] sm:$0x1] %v290_v6 }
  0x90   : > { %v295_v12 = vld [vmem:[#allocation2] sm:$0xff] }
  0x91   : > { %296 = vadd.xlane.f32.xlu0 %v295_v12 }
 0x11e   : > { %v297_v13 = vpop.xlane.xlu0 %296 }
 0x11f   : > { %298 = vst [vmem:[%s189_s21] sm:$0xff] %v297_v13 }
 0x120   : > { %525 = shalt.err (!%p522_p4)
}
 0x121   : > { %s526_s28 = scalar_lea.hbm %s753_s19, 128  ;;  %s530_s5 = scalar_lea.hbm %s802_s2, 256 }
 0x122   : > { %p527_p10 = scmp.ne.s32.totalorder %s753_s19, %s526_s28  ;;  %p531_p2 = scmp.lt.u32.totalorder %s753_s19, %s802_s2 }
 0x123   : > { %p532_p5 = scmp.lt.u32.totalorder %s530_s5, %s526_s28  ;;  %p534_p8 = scmp.lt.u32.totalorder %s526_s28, %s753_s19 }
 0x124   : > { %p528_p12 = pnand %p527_p10, %p811_p11 }
 0x125   : > { %p533_p9 = por %p532_p5, %p531_p2 }
 0x126   : > { %p529_p1 = pneg %p528_p12 }
 0x127   : > { %p535_p0 = por %p534_p8, %p533_p9 }
 0x129   : > { %p536_p7 = pnand %p535_p0, %p529_p1 }
 0x12b   : > { %539 = shalt.err (!%p536_p7)
}
 0x12c   : > { %417 = dma.vmem_to_hbm [thread:$0]  (%p811_p11), %s748_s8, 128, %s753_s19, %s300_s20  }
 0x12d PF: > { %s325_s6 = sand.u32 1, %s574_s9   ;;  %p812_p13 = scmp.ne.s32.totalorder %s807_s24, 0 }
 0x12e   : > { %p813_p3 = scmp.ge.s32.totalorder %s594_s14, 2  ;;  %s326_s7 = scalar_lea.sflag [#allocation5], %s325_s6 }
 0x130   : > { %p424_p6 = pnand %p813_p3, %p812_p13 }
 0x132   : > { %569 = dma.done.wait (!%p424_p6), %s326_s7, 128  }
 0x133   : > { %571 = vsyncadd (!%p424_p6), %s326_s7, 4294967168  ;;  %s18_s14 = sadd.s32 1, %s594_s14   ;;  %s814_s9 = smov %s578_s10 }
 0x134   : > { %p15_p4 = scmp.ge.s32.totalorder %s18_s14, 4   ;;  %s815_s10 = smov %s582_s11 }
 0x135   : > { %s816_s11 = smov %s670_s23  ;;  %s817_s12 = smov %s590_s13 }
 0x136   : > { %s818_s13 = smov %s820_s17  ;;  %17 = sbr.rel (!%p15_p4) target bundleno = 6 (0x6), region = 84 }
 0x13d   :  { %331 = vsyncpa [#allocation4], 1 }
 0x13e   :  { %333 = vsyncpa [#allocation4 + $0x1], 1 }
 0x13f   :  { %334 = vsyncpa [#allocation5], 1 }
 0x140   :  { %336 = vsyncpa [#allocation5 + $0x1], 1 }

</bundles_post_ra>
